<compile_context>
chip_gen: v7x
topology: tpu7x:2x2x1
jax: 0.10.0
libtpu: 0.0.40
codegen_flags: <defaults>
</compile_context>

<pallas_src>
import jax
import jax.numpy as jnp
import numpy as np
from jax.experimental import pallas as pl
from jax.experimental.pallas import tpu as pltpu


# ----------------------------------------------------------------------------
# Fused Pallas kernel: one grid step == one block of BB batch elements.
# ----------------------------------------------------------------------------
def _tri_attention_kernel(v_ref, q_ref, kg_ref,
                          wv_ref, bv_ref, wq_ref, bq_ref, wk_ref, bk_ref,
                          cq_ref, ck_ref, rq_ref, rk_ref, tef_ref,
                          p_ref, logits_ref):
    f32 = jnp.float32
    BB, Nv, _ = v_ref.shape
    Nq = q_ref.shape[1]
    Nk = kg_ref.shape[1]
    H = wv_ref.shape[1]
    G = p_ref.shape[1]
    NQK = Nq * Nk

    wv = wv_ref[...]; bv = bv_ref[...]
    wq = wq_ref[...]; bq = bq_ref[...]
    wk = wk_ref[...]; bk = bk_ref[...]
    cq = cq_ref[...]; ck = ck_ref[...]
    rq = rq_ref[...]; rk = rk_ref[...]
    tef = tef_ref[...]

    def proj(x, w, b):               # FCNet: Linear + ReLU (dropout = identity at eval)
        return jnp.maximum(jnp.dot(x, w, preferred_element_type=f32) + b, 0.0)

    # Per-element projections and joint (e,f) outer products, built exclusively from
    # 2-D MXU dots against precomputed 0/1 matrices (no broadcast+reshape relayouts).
    v_ts, masks, p_blocks = [], [], []
    for i in range(BB):              # static, small batch block
        v_raw = v_ref[i]                                             # (Nv, Dv)
        v_t = proj(v_raw, wv, bv)                                    # (Nv, H)
        q_t = proj(q_ref[i], wq, bq)                                 # (Nq, H)
        k_t = proj(kg_ref[i], wk, bk)                                # (Nk, H)
        v_ts.append(v_t)
        # zero-row mask computed from the RAW v input (PyTorch semantics)
        masks.append(jnp.sum(jnp.abs(v_raw), axis=1, keepdims=True) == 0.0)
        # P[(q,k), e*H+f] = q_t[q,e] * k_t[k,f]; fed directly into the stacked dot.
        p_blocks.append(
            jnp.dot(rq, jnp.dot(q_t, cq, preferred_element_type=f32),
                    preferred_element_type=f32)
            * jnp.dot(rk, jnp.dot(k_t, ck, preferred_element_type=f32),
                      preferred_element_type=f32))                   # (NQK, H*H)

    # Stack the batch block into the M dimension of the dominant contraction.
    p_all = p_blocks[0] if BB == 1 else jnp.concatenate(p_blocks, axis=0)  # (BB*NQK, H*H)
    # Rank already pre-summed into tef: W[(b,q,k), g*H+d] = sum_{e,f} P * T_ef
    w_all = jnp.dot(p_all, tef, preferred_element_type=f32)               # (BB*NQK, G*H)

    for i in range(BB):
        w_i = w_all[i * NQK:(i + 1) * NQK, :]                        # (NQK, G*H)
        v_t = v_ts[i]
        masked_rows = masks[i]                                       # (Nv, 1)
        for g in range(G):           # static, small glimpse count
            wg = w_i[:, g * H:(g + 1) * H]                           # (NQK, H)
            # Lg[v, (q,k)] = sum_d v_t[v,d] * wg[(q,k),d]
            lg = jax.lax.dot_general(v_t, wg, (((1,), (1,)), ((), ())),
                                     preferred_element_type=f32)     # (Nv, NQK)
            lg = jnp.where(masked_rows, -jnp.inf, lg)
            # softmax over the joint (v, q, k) index
            m = jnp.max(jnp.max(lg, axis=1, keepdims=True), axis=0, keepdims=True)
            e = jnp.exp(lg - m)
            s = jnp.sum(jnp.sum(e, axis=1, keepdims=True), axis=0, keepdims=True)
            pg = e * pl.reciprocal(s)      # exact; (approx=True possible if atol allows)
            # lane-dense writes: full (Nv, NQK) slab per glimpse
            logits_ref[i, g] = lg
            p_ref[i, g] = pg


# ----------------------------------------------------------------------------
# Parameter preparation (done ONCE, outside the hot path).
# ----------------------------------------------------------------------------
def prepare_params(params):
    """Pre-sum the core tensor over rank and build kernel-layout 0/1 expansion mats."""
    Tg = np.asarray(params["Tg"])                       # (1, R, H, H, H, G)
    H, G = Tg.shape[2], Tg.shape[5]
    prepared = dict(params)
    # rank sum is linear => exact:  T_sum[d,e,f,g] = sum_r Tg[0,r,d,e,f,g]
    T_sum = Tg[0].sum(axis=0)                           # (H, H, H, G) indexed (d,e,f,g)
    # kernel layout: T_ef[e*H+f, g*H+d]
    prepared["T_ef"] = jnp.asarray(
        np.transpose(T_sum, (1, 2, 3, 0)).reshape(H * H, G * H).astype(np.float32))
    eye = np.eye(H, dtype=np.float32)
    prepared["Cq"] = jnp.asarray(np.repeat(eye, H, axis=1))   # Cq[e', e*H+f] = (e'==e)
    prepared["Ck"] = jnp.asarray(np.tile(eye, (1, H)))        # Ck[f', e*H+f] = (f'==f)
    return prepared


def _pick_batch_block(B, NQK):
    """Batch elements fused per grid step: target M = BB*NQK >= 256 MXU rows while
    keeping >= 2 grid steps (v7x has two TensorCores) and BB a divisor of B."""
    if B <= 1:
        return 1
    target = max(1, (256 + NQK - 1) // NQK)
    best = 1
    for bb in range(1, B + 1):
        if B % bb == 0 and B // bb >= 2 and bb <= target:
            best = max(best, bb)
    return best


# ----------------------------------------------------------------------------
# Forward pass: a single fused pallas_call over batch blocks.
# ----------------------------------------------------------------------------
@jax.jit
def tri_attention_forward(params, v, q, kg):
    B, Nv, Dv = v.shape
    _, Nq, Dq = q.shape
    _, Nk, Dk = kg.shape
    H = params["Wv"].shape[1]
    G = params["T_ef"].shape[1] // H
    NQK = Nq * Nk

    BB = _pick_batch_block(B, NQK)
    num_blocks = B // BB

    # 0/1 row-replication matrices (trace-time constants; tiny)
    Rq = np.repeat(np.eye(Nq, dtype=np.float32), Nk, axis=0)   # Rq[q*Nk+k, q'] = (q'==q)
    Rk = np.tile(np.eye(Nk, dtype=np.float32), (Nq, 1))        # Rk[q*Nk+k, k'] = (k'==k)

    const2 = lambda b: (0, 0)
    in_specs = [
        pl.BlockSpec((BB, Nv, Dv), lambda b: (b, 0, 0)),
        pl.BlockSpec((BB, Nq, Dq), lambda b: (b, 0, 0)),
        pl.BlockSpec((BB, Nk, Dk), lambda b: (b, 0, 0)),
        pl.BlockSpec((Dv, H), const2),
        pl.BlockSpec((1, H), const2),
        pl.BlockSpec((Dq, H), const2),
        pl.BlockSpec((1, H), const2),
        pl.BlockSpec((Dk, H), const2),
        pl.BlockSpec((1, H), const2),
        pl.BlockSpec((H, H * H), const2),        # Cq
        pl.BlockSpec((H, H * H), const2),        # Ck
        pl.BlockSpec((NQK, Nq), const2),         # Rq
        pl.BlockSpec((NQK, Nk), const2),         # Rk
        pl.BlockSpec((H * H, G * H), const2),    # T_ef (rank pre-summed)
    ]
    # lane-dense output layout: (B, G, Nv, Nq*Nk)
    out_specs = (
        pl.BlockSpec((BB, G, Nv, NQK), lambda b: (b, 0, 0, 0)),
        pl.BlockSpec((BB, G, Nv, NQK), lambda b: (b, 0, 0, 0)),
    )
    out_shape = (
        jax.ShapeDtypeStruct((B, G, Nv, NQK), jnp.float32),
        jax.ShapeDtypeStruct((B, G, Nv, NQK), jnp.float32),
    )

    p_gd, logits_gd = pl.pallas_call(
        _tri_attention_kernel,
        out_shape=out_shape,
        grid=(num_blocks,),
        in_specs=in_specs,
        out_specs=out_specs,
        compiler_params=pltpu.CompilerParams(
            dimension_semantics=("parallel",),
            vmem_limit_bytes=32 * 1024 * 1024),
    )(v, q, kg,
      params["Wv"], params["bv"], params["Wq"], params["bq"],
      params["Wk"], params["bk"],
      params["Cq"], params["Ck"], Rq, Rk, params["T_ef"])

    # layout fix-up to the PyTorch-compatible output: (B, Nv, Nq, Nk, G)
    p = jnp.transpose(p_gd, (0, 2, 3, 1)).reshape(B, Nv, Nq, Nk, G)
    logits = jnp.transpose(logits_gd, (0, 2, 3, 1)).reshape(B, Nv, Nq, Nk, G)
    return p, logits


# ----------------------------------------------------------------------------
# Pure-JAX reference (mirrors the PyTorch forward semantics)
# ----------------------------------------------------------------------------
def tri_attention_reference(params, v, q, kg):
    v_t = jax.nn.relu(v @ params["Wv"] + params["bv"][0])
    q_t = jax.nn.relu(q @ params["Wq"] + params["bq"][0])
    kg_t = jax.nn.relu(kg @ params["Wk"] + params["bk"][0])
    Tg = params["Tg"][0]                                   # (R, H, H, H, G)
    logits = jnp.einsum("bvd,bqe,bkf,rdefg->bvqkg", v_t, q_t, kg_t, Tg)
    row_zero = (jnp.sum(jnp.abs(v), axis=2) == 0.0)
    logits = jnp.where(row_zero[:, :, None, None, None], float("-inf"), logits)
    B, Nv, Nq, Nk, G = logits.shape
    p = jax.nn.softmax(logits.reshape(B, Nv * Nq * Nk, G), axis=1)
    return p.reshape(B, Nv, Nq, Nk, G), logits


if __name__ == "__main__":
    key = jax.random.PRNGKey(0)
    # TriAttention(v_dim=16, q_dim=16, kg_dim=16, h_dim=16, h_out=1, rank=2, glimpse=2, k=1)
    B, Nv, Nq, Nk = 2, 8, 8, 8
    Dv, Dq, Dk = 16, 16, 16
    H, R, G = 16, 2, 2

    ks = jax.random.split(key, 10)
    v = jax.random.normal(ks[0], (B, Nv, Dv), jnp.float32)
    q = jax.random.normal(ks[1], (B, Nq, Dq), jnp.float32)
    kg = jax.random.normal(ks[2], (B, Nk, Dk), jnp.float32)
    v = v.at[0, Nv - 1, :].set(0.0)          # exercise the -inf mask path

    params = {
        "Wv": jax.random.normal(ks[3], (Dv, H), jnp.float32) * 0.1,
        "bv": jax.random.normal(ks[4], (1, H), jnp.float32) * 0.1,
        "Wq": jax.random.normal(ks[5], (Dq, H), jnp.float32) * 0.1,
        "bq": jax.random.normal(ks[6], (1, H), jnp.float32) * 0.1,
        "Wk": jax.random.normal(ks[7], (Dk, H), jnp.float32) * 0.1,
        "bk": jax.random.normal(ks[8], (1, H), jnp.float32) * 0.1,
        "Tg": jax.random.normal(ks[9], (1, R, H, H, H, G), jnp.float32) * 0.1,
    }

    prepared = prepare_params(params)        # one-time rank pre-sum + layout precompute

    # --- config 1: B=2 (BB=1, grid=(2,)) ---------------------------------------
    p, logits = jax.block_until_ready(tri_attention_forward(prepared, v, q, kg))
    p_ref, logits_ref = tri_attention_reference(params, v, q, kg)
    assert p.shape == (B, Nv, Nq, Nk, G) and logits.shape == (B, Nv, Nq, Nk, G)
    np.testing.assert_allclose(np.asarray(logits), np.asarray(logits_ref), rtol=1e-4, atol=1e-4)
    np.testing.assert_allclose(np.asarray(p), np.asarray(p_ref), rtol=1e-4, atol=1e-5)

    # --- config 2: B=8 exercises batch blocking (BB=4, grid=(2,)) ---------------
    ks2 = jax.random.split(jax.random.PRNGKey(1), 3)
    B2 = 8
    v2 = jax.random.normal(ks2[0], (B2, Nv, Dv), jnp.float32)
    q2 = jax.random.normal(ks2[1], (B2, Nq, Dq), jnp.float32)
    kg2 = jax.random.normal(ks2[2], (B2, Nk, Dk), jnp.float32)
    v2 = v2.at[3, 0, :].set(0.0)
    p2, logits2 = jax.block_until_ready(tri_attention_forward(prepared, v2, q2, kg2))
    p2_ref, logits2_ref = tri_attention_reference(params, v2, q2, kg2)
    np.testing.assert_allclose(np.asarray(logits2), np.asarray(logits2_ref), rtol=1e-4, atol=1e-4)
    np.testing.assert_allclose(np.asarray(p2), np.asarray(p2_ref), rtol=1e-4, atol=1e-5)

    print("KERNEL_OK")
</pallas_src>

<mosaic_0001>
module attributes {stable_mosaic.version = 11 : i64} {
  func.func @_tri_attention_kernel(%arg0: i32, %arg1: memref<1x8x16xf32, #tpu.memory_space<vmem>>, %arg2: memref<1x8x16xf32, #tpu.memory_space<vmem>>, %arg3: memref<1x8x16xf32, #tpu.memory_space<vmem>>, %arg4: memref<16x16xf32, #tpu.memory_space<vmem>>, %arg5: memref<1x16xf32, #tpu.memory_space<vmem>>, %arg6: memref<16x16xf32, #tpu.memory_space<vmem>>, %arg7: memref<1x16xf32, #tpu.memory_space<vmem>>, %arg8: memref<16x16xf32, #tpu.memory_space<vmem>>, %arg9: memref<1x16xf32, #tpu.memory_space<vmem>>, %arg10: memref<16x256xf32, #tpu.memory_space<vmem>>, %arg11: memref<16x256xf32, #tpu.memory_space<vmem>>, %arg12: memref<64x8xf32, #tpu.memory_space<vmem>>, %arg13: memref<64x8xf32, #tpu.memory_space<vmem>>, %arg14: memref<256x32xf32, #tpu.memory_space<vmem>>, %arg15: memref<1x2x8x64xf32, #tpu.memory_space<vmem>>, %arg16: memref<1x2x8x64xf32, #tpu.memory_space<vmem>>) attributes {dimension_semantics = [#tpu.dimension_semantics<parallel>], iteration_bounds = array<i64: 2>, scalar_prefetch = 0 : i64, scratch_operands = 0 : i64, tpu.core_type = #tpu.core_type<tc>, window_params = [{transform_indices = @transform_0, window_bounds = array<i64: 1, 8, 16>}, {transform_indices = @transform_1, window_bounds = array<i64: 1, 8, 16>}, {transform_indices = @transform_2, window_bounds = array<i64: 1, 8, 16>}, {pipeline_mode = #tpu.pipeline_mode<synchronous>, transform_indices = @transform_3, window_bounds = array<i64: 16, 16>}, {pipeline_mode = #tpu.pipeline_mode<synchronous>, transform_indices = @transform_4, window_bounds = array<i64: 1, 16>}, {pipeline_mode = #tpu.pipeline_mode<synchronous>, transform_indices = @transform_5, window_bounds = array<i64: 16, 16>}, {pipeline_mode = #tpu.pipeline_mode<synchronous>, transform_indices = @transform_6, window_bounds = array<i64: 1, 16>}, {pipeline_mode = #tpu.pipeline_mode<synchronous>, transform_indices = @transform_7, window_bounds = array<i64: 16, 16>}, {pipeline_mode = #tpu.pipeline_mode<synchronous>, transform_indices = @transform_8, window_bounds = array<i64: 1, 16>}, {pipeline_mode = #tpu.pipeline_mode<synchronous>, transform_indices = @transform_9, window_bounds = array<i64: 16, 256>}, {pipeline_mode = #tpu.pipeline_mode<synchronous>, transform_indices = @transform_10, window_bounds = array<i64: 16, 256>}, {pipeline_mode = #tpu.pipeline_mode<synchronous>, transform_indices = @transform_11, window_bounds = array<i64: 64, 8>}, {pipeline_mode = #tpu.pipeline_mode<synchronous>, transform_indices = @transform_12, window_bounds = array<i64: 64, 8>}, {pipeline_mode = #tpu.pipeline_mode<synchronous>, transform_indices = @transform_13, window_bounds = array<i64: 256, 32>}, {transform_indices = @transform_14, window_bounds = array<i64: 1, 2, 8, 64>}, {transform_indices = @transform_15, window_bounds = array<i64: 1, 2, 8, 64>}]} {
    %c0 = arith.constant 0 : index
    %c0_0 = arith.constant 0 : index
    %0 = vector.load %arg4[%c0, %c0_0] : memref<16x16xf32, #tpu.memory_space<vmem>>, vector<16x16xf32>
    %c0_1 = arith.constant 0 : index
    %c0_2 = arith.constant 0 : index
    %1 = vector.load %arg5[%c0_1, %c0_2] : memref<1x16xf32, #tpu.memory_space<vmem>>, vector<1x16xf32>
    %c0_3 = arith.constant 0 : index
    %c0_4 = arith.constant 0 : index
    %2 = vector.load %arg6[%c0_3, %c0_4] : memref<16x16xf32, #tpu.memory_space<vmem>>, vector<16x16xf32>
    %c0_5 = arith.constant 0 : index
    %c0_6 = arith.constant 0 : index
    %3 = vector.load %arg7[%c0_5, %c0_6] : memref<1x16xf32, #tpu.memory_space<vmem>>, vector<1x16xf32>
    %c0_7 = arith.constant 0 : index
    %c0_8 = arith.constant 0 : index
    %4 = vector.load %arg8[%c0_7, %c0_8] : memref<16x16xf32, #tpu.memory_space<vmem>>, vector<16x16xf32>
    %c0_9 = arith.constant 0 : index
    %c0_10 = arith.constant 0 : index
    %5 = vector.load %arg9[%c0_9, %c0_10] : memref<1x16xf32, #tpu.memory_space<vmem>>, vector<1x16xf32>
    %c0_11 = arith.constant 0 : index
    %c0_12 = arith.constant 0 : index
    %6 = vector.load %arg10[%c0_11, %c0_12] : memref<16x256xf32, #tpu.memory_space<vmem>>, vector<16x256xf32>
    %c0_13 = arith.constant 0 : index
    %c0_14 = arith.constant 0 : index
    %7 = vector.load %arg11[%c0_13, %c0_14] : memref<16x256xf32, #tpu.memory_space<vmem>>, vector<16x256xf32>
    %c0_15 = arith.constant 0 : index
    %c0_16 = arith.constant 0 : index
    %8 = vector.load %arg12[%c0_15, %c0_16] : memref<64x8xf32, #tpu.memory_space<vmem>>, vector<64x8xf32>
    %c0_17 = arith.constant 0 : index
    %c0_18 = arith.constant 0 : index
    %9 = vector.load %arg13[%c0_17, %c0_18] : memref<64x8xf32, #tpu.memory_space<vmem>>, vector<64x8xf32>
    %c0_19 = arith.constant 0 : index
    %c0_20 = arith.constant 0 : index
    %10 = vector.load %arg14[%c0_19, %c0_20] : memref<256x32xf32, #tpu.memory_space<vmem>>, vector<256x32xf32>
    %c0_21 = arith.constant 0 : index
    %c0_22 = arith.constant 0 : index
    %c0_23 = arith.constant 0 : index
    %11 = vector.load %arg1[%c0_21, %c0_22, %c0_23] : memref<1x8x16xf32, #tpu.memory_space<vmem>>, vector<1x8x16xf32>
    %12 = vector.shape_cast %11 : vector<1x8x16xf32> to vector<8x16xf32>
    %cst = arith.constant dense<0.000000e+00> : vector<8x16xf32>
    %13 = tpu.matmul %12, %0, %cst {dimension_numbers = #tpu.dot_dimension_numbers<[1], [0], [0], [1], [0, 0, 1, 1], [], []>} : vector<8x16xf32>, vector<16x16xf32>, vector<8x16xf32> -> vector<8x16xf32>
    %14 = vector.broadcast %1 : vector<1x16xf32> to vector<8x16xf32>
    %15 = arith.addf %13, %14 : vector<8x16xf32>
    %cst_24 = arith.constant 0.000000e+00 : f32
    %16 = vector.broadcast %cst_24 : f32 to vector<8x16xf32>
    %17 = arith.maximumf %15, %16 : vector<8x16xf32>
    %c0_25 = arith.constant 0 : index
    %c0_26 = arith.constant 0 : index
    %c0_27 = arith.constant 0 : index
    %18 = vector.load %arg2[%c0_25, %c0_26, %c0_27] : memref<1x8x16xf32, #tpu.memory_space<vmem>>, vector<1x8x16xf32>
    %19 = vector.shape_cast %18 : vector<1x8x16xf32> to vector<8x16xf32>
    %cst_28 = arith.constant dense<0.000000e+00> : vector<8x16xf32>
    %20 = tpu.matmul %19, %2, %cst_28 {dimension_numbers = #tpu.dot_dimension_numbers<[1], [0], [0], [1], [0, 0, 1, 1], [], []>} : vector<8x16xf32>, vector<16x16xf32>, vector<8x16xf32> -> vector<8x16xf32>
    %21 = vector.broadcast %3 : vector<1x16xf32> to vector<8x16xf32>
    %22 = arith.addf %20, %21 : vector<8x16xf32>
    %cst_29 = arith.constant 0.000000e+00 : f32
    %23 = vector.broadcast %cst_29 : f32 to vector<8x16xf32>
    %24 = arith.maximumf %22, %23 : vector<8x16xf32>
    %c0_30 = arith.constant 0 : index
    %c0_31 = arith.constant 0 : index
    %c0_32 = arith.constant 0 : index
    %25 = vector.load %arg3[%c0_30, %c0_31, %c0_32] : memref<1x8x16xf32, #tpu.memory_space<vmem>>, vector<1x8x16xf32>
    %26 = vector.shape_cast %25 : vector<1x8x16xf32> to vector<8x16xf32>
    %cst_33 = arith.constant dense<0.000000e+00> : vector<8x16xf32>
    %27 = tpu.matmul %26, %4, %cst_33 {dimension_numbers = #tpu.dot_dimension_numbers<[1], [0], [0], [1], [0, 0, 1, 1], [], []>} : vector<8x16xf32>, vector<16x16xf32>, vector<8x16xf32> -> vector<8x16xf32>
    %28 = vector.broadcast %5 : vector<1x16xf32> to vector<8x16xf32>
    %29 = arith.addf %27, %28 : vector<8x16xf32>
    %cst_34 = arith.constant 0.000000e+00 : f32
    %30 = vector.broadcast %cst_34 : f32 to vector<8x16xf32>
    %31 = arith.maximumf %29, %30 : vector<8x16xf32>
    %32 = math.absf %12 : vector<8x16xf32>
    %cst_35 = arith.constant dense<0.000000e+00> : vector<8xf32>
    %33 = vector.multi_reduction <add>, %32, %cst_35 [1] : vector<8x16xf32> to vector<8xf32>
    %34 = vector.shape_cast %33 : vector<8xf32> to vector<8x1xf32>
    %cst_36 = arith.constant 0.000000e+00 : f32
    %35 = vector.broadcast %cst_36 : f32 to vector<8x1xf32>
    %36 = arith.cmpf oeq, %34, %35 : vector<8x1xf32>
    %cst_37 = arith.constant dense<0.000000e+00> : vector<8x256xf32>
    %37 = tpu.matmul %24, %6, %cst_37 {dimension_numbers = #tpu.dot_dimension_numbers<[1], [0], [0], [1], [0, 0, 1, 1], [], []>} : vector<8x16xf32>, vector<16x256xf32>, vector<8x256xf32> -> vector<8x256xf32>
    %cst_38 = arith.constant dense<0.000000e+00> : vector<64x256xf32>
    %38 = tpu.matmul %8, %37, %cst_38 {dimension_numbers = #tpu.dot_dimension_numbers<[1], [0], [0], [1], [0, 0, 1, 1], [], []>} : vector<64x8xf32>, vector<8x256xf32>, vector<64x256xf32> -> vector<64x256xf32>
    %cst_39 = arith.constant dense<0.000000e+00> : vector<8x256xf32>
    %39 = tpu.matmul %31, %7, %cst_39 {dimension_numbers = #tpu.dot_dimension_numbers<[1], [0], [0], [1], [0, 0, 1, 1], [], []>} : vector<8x16xf32>, vector<16x256xf32>, vector<8x256xf32> -> vector<8x256xf32>
    %cst_40 = arith.constant dense<0.000000e+00> : vector<64x256xf32>
    %40 = tpu.matmul %9, %39, %cst_40 {dimension_numbers = #tpu.dot_dimension_numbers<[1], [0], [0], [1], [0, 0, 1, 1], [], []>} : vector<64x8xf32>, vector<8x256xf32>, vector<64x256xf32> -> vector<64x256xf32>
    %41 = arith.mulf %38, %40 : vector<64x256xf32>
    %cst_41 = arith.constant dense<0.000000e+00> : vector<64x32xf32>
    %42 = tpu.matmul %41, %10, %cst_41 {dimension_numbers = #tpu.dot_dimension_numbers<[1], [0], [0], [1], [0, 0, 1, 1], [], []>} : vector<64x256xf32>, vector<256x32xf32>, vector<64x32xf32> -> vector<64x32xf32>
    %43 = vector.extract_strided_slice %42 {offsets = [0, 0], sizes = [64, 16], strides = [1, 1]} : vector<64x32xf32> to vector<64x16xf32>
    %cst_42 = arith.constant dense<0.000000e+00> : vector<8x64xf32>
    %44 = tpu.matmul %17, %43, %cst_42 {dimension_numbers = #tpu.dot_dimension_numbers<[1], [1], [0], [0], [0, 0, 1, 0], [], []>} : vector<8x16xf32>, vector<64x16xf32>, vector<8x64xf32> -> vector<8x64xf32>
    %cst_43 = arith.constant 0xFF800000 : f32
    %45 = vector.shape_cast %36 : vector<8x1xi1> to vector<8x1xi1>
    %46 = vector.broadcast %45 : vector<8x1xi1> to vector<8x64xi1>
    %47 = vector.broadcast %cst_43 : f32 to vector<8x64xf32>
    %48 = arith.select %46, %47, %44 : vector<8x64xi1>, vector<8x64xf32>
    %cst_44 = arith.constant dense<0xFF800000> : vector<8xf32>
    %49 = vector.multi_reduction <maximumf>, %48, %cst_44 [1] : vector<8x64xf32> to vector<8xf32>
    %50 = vector.shape_cast %49 : vector<8xf32> to vector<8x1xf32>
    %cst_45 = arith.constant dense<0xFF800000> : vector<1xf32>
    %51 = vector.multi_reduction <maximumf>, %50, %cst_45 [0] : vector<8x1xf32> to vector<1xf32>
    %52 = vector.shape_cast %51 : vector<1xf32> to vector<1x1xf32>
    %53 = vector.broadcast %52 : vector<1x1xf32> to vector<8x64xf32>
    %54 = arith.subf %48, %53 : vector<8x64xf32>
    %55 = math.exp %54 : vector<8x64xf32>
    %cst_46 = arith.constant dense<0.000000e+00> : vector<8xf32>
    %56 = vector.multi_reduction <add>, %55, %cst_46 [1] : vector<8x64xf32> to vector<8xf32>
    %57 = vector.shape_cast %56 : vector<8xf32> to vector<8x1xf32>
    %cst_47 = arith.constant dense<0.000000e+00> : vector<1xf32>
    %58 = vector.multi_reduction <add>, %57, %cst_47 [0] : vector<8x1xf32> to vector<1xf32>
    %59 = vector.shape_cast %58 : vector<1xf32> to vector<1x1xf32>
    %60 = tpu.reciprocal %59 : vector<1x1xf32> -> vector<1x1xf32>
    %61 = vector.broadcast %60 : vector<1x1xf32> to vector<8x64xf32>
    %62 = arith.mulf %55, %61 : vector<8x64xf32>
    %c0_48 = arith.constant 0 : index
    %c0_49 = arith.constant 0 : index
    %c0_50 = arith.constant 0 : index
    %c0_51 = arith.constant 0 : index
    %63 = vector.load %arg16[%c0_48, %c0_49, %c0_50, %c0_51] : memref<1x2x8x64xf32, #tpu.memory_space<vmem>>, vector<1x1x8x64xf32>
    %64 = vector.shape_cast %63 : vector<1x1x8x64xf32> to vector<8x64xf32>
    %65 = vector.shape_cast %48 : vector<8x64xf32> to vector<1x1x8x64xf32>
    tpu.vector_store %arg16[%c0_48, %c0_49, %c0_50, %c0_51], %65 {strides = array<i32>} : memref<1x2x8x64xf32, #tpu.memory_space<vmem>>, vector<1x1x8x64xf32>,
    %c0_52 = arith.constant 0 : index
    %c0_53 = arith.constant 0 : index
    %c0_54 = arith.constant 0 : index
    %c0_55 = arith.constant 0 : index
    %66 = vector.load %arg15[%c0_52, %c0_53, %c0_54, %c0_55] : memref<1x2x8x64xf32, #tpu.memory_space<vmem>>, vector<1x1x8x64xf32>
    %67 = vector.shape_cast %66 : vector<1x1x8x64xf32> to vector<8x64xf32>
    %68 = vector.shape_cast %62 : vector<8x64xf32> to vector<1x1x8x64xf32>
    tpu.vector_store %arg15[%c0_52, %c0_53, %c0_54, %c0_55], %68 {strides = array<i32>} : memref<1x2x8x64xf32, #tpu.memory_space<vmem>>, vector<1x1x8x64xf32>,
    %69 = vector.extract_strided_slice %42 {offsets = [0, 16], sizes = [64, 16], strides = [1, 1]} : vector<64x32xf32> to vector<64x16xf32>
    %cst_56 = arith.constant dense<0.000000e+00> : vector<8x64xf32>
    %70 = tpu.matmul %17, %69, %cst_56 {dimension_numbers = #tpu.dot_dimension_numbers<[1], [1], [0], [0], [0, 0, 1, 0], [], []>} : vector<8x16xf32>, vector<64x16xf32>, vector<8x64xf32> -> vector<8x64xf32>
    %cst_57 = arith.constant 0xFF800000 : f32
    %71 = vector.shape_cast %36 : vector<8x1xi1> to vector<8x1xi1>
    %72 = vector.broadcast %71 : vector<8x1xi1> to vector<8x64xi1>
    %73 = vector.broadcast %cst_57 : f32 to vector<8x64xf32>
    %74 = arith.select %72, %73, %70 : vector<8x64xi1>, vector<8x64xf32>
    %cst_58 = arith.constant dense<0xFF800000> : vector<8xf32>
    %75 = vector.multi_reduction <maximumf>, %74, %cst_58 [1] : vector<8x64xf32> to vector<8xf32>
    %76 = vector.shape_cast %75 : vector<8xf32> to vector<8x1xf32>
    %cst_59 = arith.constant dense<0xFF800000> : vector<1xf32>
    %77 = vector.multi_reduction <maximumf>, %76, %cst_59 [0] : vector<8x1xf32> to vector<1xf32>
    %78 = vector.shape_cast %77 : vector<1xf32> to vector<1x1xf32>
    %79 = vector.broadcast %78 : vector<1x1xf32> to vector<8x64xf32>
    %80 = arith.subf %74, %79 : vector<8x64xf32>
    %81 = math.exp %80 : vector<8x64xf32>
    %cst_60 = arith.constant dense<0.000000e+00> : vector<8xf32>
    %82 = vector.multi_reduction <add>, %81, %cst_60 [1] : vector<8x64xf32> to vector<8xf32>
    %83 = vector.shape_cast %82 : vector<8xf32> to vector<8x1xf32>
    %cst_61 = arith.constant dense<0.000000e+00> : vector<1xf32>
    %84 = vector.multi_reduction <add>, %83, %cst_61 [0] : vector<8x1xf32> to vector<1xf32>
    %85 = vector.shape_cast %84 : vector<1xf32> to vector<1x1xf32>
    %86 = tpu.reciprocal %85 : vector<1x1xf32> -> vector<1x1xf32>
    %87 = vector.broadcast %86 : vector<1x1xf32> to vector<8x64xf32>
    %88 = arith.mulf %81, %87 : vector<8x64xf32>
    %c0_62 = arith.constant 0 : index
    %c1 = arith.constant 1 : index
    %c0_63 = arith.constant 0 : index
    %c0_64 = arith.constant 0 : index
    %89 = vector.load %arg16[%c0_62, %c1, %c0_63, %c0_64] : memref<1x2x8x64xf32, #tpu.memory_space<vmem>>, vector<1x1x8x64xf32>
    %90 = vector.shape_cast %89 : vector<1x1x8x64xf32> to vector<8x64xf32>
    %91 = vector.shape_cast %74 : vector<8x64xf32> to vector<1x1x8x64xf32>
    tpu.vector_store %arg16[%c0_62, %c1, %c0_63, %c0_64], %91 {strides = array<i32>} : memref<1x2x8x64xf32, #tpu.memory_space<vmem>>, vector<1x1x8x64xf32>,
    %c0_65 = arith.constant 0 : index
    %c1_66 = arith.constant 1 : index
    %c0_67 = arith.constant 0 : index
    %c0_68 = arith.constant 0 : index
    %92 = vector.load %arg15[%c0_65, %c1_66, %c0_67, %c0_68] : memref<1x2x8x64xf32, #tpu.memory_space<vmem>>, vector<1x1x8x64xf32>
    %93 = vector.shape_cast %92 : vector<1x1x8x64xf32> to vector<8x64xf32>
    %94 = vector.shape_cast %88 : vector<8x64xf32> to vector<1x1x8x64xf32>
    tpu.vector_store %arg15[%c0_65, %c1_66, %c0_67, %c0_68], %94 {strides = array<i32>} : memref<1x2x8x64xf32, #tpu.memory_space<vmem>>, vector<1x1x8x64xf32>,
    return
  }
  func.func @transform_0(%arg0: i32) -> (i32, i32, i32) {
    %c0_i32 = arith.constant 0 : i32
    %c0_i32_0 = arith.constant 0 : i32
    %c0_i32_1 = arith.constant 0 : i32
    return %arg0, %c0_i32, %c0_i32_0 : i32, i32, i32
  }
  func.func @transform_1(%arg0: i32) -> (i32, i32, i32) {
    %c0_i32 = arith.constant 0 : i32
    %c0_i32_0 = arith.constant 0 : i32
    %c0_i32_1 = arith.constant 0 : i32
    return %arg0, %c0_i32, %c0_i32_0 : i32, i32, i32
  }
  func.func @transform_2(%arg0: i32) -> (i32, i32, i32) {
    %c0_i32 = arith.constant 0 : i32
    %c0_i32_0 = arith.constant 0 : i32
    %c0_i32_1 = arith.constant 0 : i32
    return %arg0, %c0_i32, %c0_i32_0 : i32, i32, i32
  }
  func.func @transform_3(%arg0: i32) -> (i32, i32) {
    %c0_i32 = arith.constant 0 : i32
    %c0_i32_0 = arith.constant 0 : i32
    %c0_i32_1 = arith.constant 0 : i32
    return %c0_i32, %c0_i32_0 : i32, i32
  }
  func.func @transform_4(%arg0: i32) -> (i32, i32) {
    %c0_i32 = arith.constant 0 : i32
    %c0_i32_0 = arith.constant 0 : i32
    %c0_i32_1 = arith.constant 0 : i32
    return %c0_i32, %c0_i32_0 : i32, i32
  }
  func.func @transform_5(%arg0: i32) -> (i32, i32) {
    %c0_i32 = arith.constant 0 : i32
    %c0_i32_0 = arith.constant 0 : i32
    %c0_i32_1 = arith.constant 0 : i32
    return %c0_i32, %c0_i32_0 : i32, i32
  }
  func.func @transform_6(%arg0: i32) -> (i32, i32) {
    %c0_i32 = arith.constant 0 : i32
    %c0_i32_0 = arith.constant 0 : i32
    %c0_i32_1 = arith.constant 0 : i32
    return %c0_i32, %c0_i32_0 : i32, i32
  }
  func.func @transform_7(%arg0: i32) -> (i32, i32) {
    %c0_i32 = arith.constant 0 : i32
    %c0_i32_0 = arith.constant 0 : i32
    %c0_i32_1 = arith.constant 0 : i32
    return %c0_i32, %c0_i32_0 : i32, i32
  }
  func.func @transform_8(%arg0: i32) -> (i32, i32) {
    %c0_i32 = arith.constant 0 : i32
    %c0_i32_0 = arith.constant 0 : i32
    %c0_i32_1 = arith.constant 0 : i32
    return %c0_i32, %c0_i32_0 : i32, i32
  }
  func.func @transform_9(%arg0: i32) -> (i32, i32) {
    %c0_i32 = arith.constant 0 : i32
    %c0_i32_0 = arith.constant 0 : i32
    %c0_i32_1 = arith.constant 0 : i32
    return %c0_i32, %c0_i32_0 : i32, i32
  }
  func.func @transform_10(%arg0: i32) -> (i32, i32) {
    %c0_i32 = arith.constant 0 : i32
    %c0_i32_0 = arith.constant 0 : i32
    %c0_i32_1 = arith.constant 0 : i32
    return %c0_i32, %c0_i32_0 : i32, i32
  }
  func.func @transform_11(%arg0: i32) -> (i32, i32) {
    %c0_i32 = arith.constant 0 : i32
    %c0_i32_0 = arith.constant 0 : i32
    %c0_i32_1 = arith.constant 0 : i32
    return %c0_i32, %c0_i32_0 : i32, i32
  }
  func.func @transform_12(%arg0: i32) -> (i32, i32) {
    %c0_i32 = arith.constant 0 : i32
    %c0_i32_0 = arith.constant 0 : i32
    %c0_i32_1 = arith.constant 0 : i32
    return %c0_i32, %c0_i32_0 : i32, i32
  }
  func.func @transform_13(%arg0: i32) -> (i32, i32) {
    %c0_i32 = arith.constant 0 : i32
    %c0_i32_0 = arith.constant 0 : i32
    %c0_i32_1 = arith.constant 0 : i32
    return %c0_i32, %c0_i32_0 : i32, i32
  }
  func.func @transform_14(%arg0: i32) -> (i32, i32, i32, i32) {
    %c0_i32 = arith.constant 0 : i32
    %c0_i32_0 = arith.constant 0 : i32
    %c0_i32_1 = arith.constant 0 : i32
    %c0_i32_2 = arith.constant 0 : i32
    return %arg0, %c0_i32, %c0_i32_0, %c0_i32_1 : i32, i32, i32, i32
  }
  func.func @transform_15(%arg0: i32) -> (i32, i32, i32, i32) {
    %c0_i32 = arith.constant 0 : i32
    %c0_i32_0 = arith.constant 0 : i32
    %c0_i32_1 = arith.constant 0 : i32
    %c0_i32_2 = arith.constant 0 : i32
    return %arg0, %c0_i32, %c0_i32_0, %c0_i32_1 : i32, i32, i32, i32
  }
}

</mosaic_0001>

<bundles_post_ra>
// kernel: tri_attention_forward.1
= control target key start
LH: loop header
LB: loop body
LE: loop exit
PB: predicated region body
PF: predicated region fallthrough
CT: control target
= control target key end

     0   :  { %s2180_s18 = smov 0   ;;  %s2513_s0 = inlined_call_operand.vmem [shape: f32[2,8,16], index: 0, kind: input, shape index: {}]   ;;  %s2514_s1 = inlined_call_operand.vmem [shape: f32[2,8,16], index: 1, kind: input, shape index: {}]   ;;  %s2515_s2 = inlined_call_operand.vmem [shape: f32[2,8,16], index: 2, kind: input, shape index: {}]   ;;  %s2516_s3 = inlined_call_operand.vmem [shape: f32[16,16], index: 3, kind: input, shape index: {}]   ;;  %s2517_s4 = inlined_call_operand.vmem [shape: f32[1,16], index: 4, kind: input, shape index: {}]   ;;  %s2518_s5 = inlined_call_operand.vmem [shape: f32[16,16], index: 5, kind: input, shape index: {}]   ;;  %s2519_s6 = inlined_call_operand.vmem [shape: f32[1,16], index: 6, kind: input, shape index: {}]   ;;  %s2520_s7 = inlined_call_operand.vmem [shape: f32[16,16], index: 7, kind: input, shape index: {}]   ;;  %s2521_s8 = inlined_call_operand.vmem [shape: f32[1,16], index: 8, kind: input, shape index: {}]   ;;  %s2522_s9 = inlined_call_operand.vmem [shape: f32[16,256], index: 9, kind: input, shape index: {}]   ;;  %s2523_s10 = inlined_call_operand.vmem [shape: f32[16,256], index: 10, kind: input, shape index: {}]   ;;  %s2524_s11 = inlined_call_operand.vmem [shape: f32[64,8], index: 11, kind: input, shape index: {}]   ;;  %s2525_s12 = inlined_call_operand.vmem [shape: f32[64,8], index: 12, kind: input, shape index: {}]   ;;  %s2526_s13 = inlined_call_operand.vmem [shape: f32[256,32], index: 13, kind: input, shape index: {}]   ;;  %s2527_s14 = inlined_call_operand.vmem [shape: f32[2,2,8,64], index: 14, kind: output, shape index: {0}]   ;;  %s2528_s15 = inlined_call_operand.vmem [shape: f32[2,2,8,64], index: 15, kind: output, shape index: {1}]  }
   0x1 LB: > { %s1765_s19 = sadd.s32 4294967295, %s2094_s18   ;;  %p1769_p0 = scmp.ge.s32.totalorder %s2094_s18, 1  ;;  %s2094_s18 = sphi %s2180_s18, %s26_s18  }
   0x2   : > { %p457_p1 = scmp.lt.s32.totalorder %s2094_s18, 3 }
   0x4   : > { %p458_p2 = pnand %p1769_p0, %p457_p1 }
   0x5   : > { %v539_v0 = vld [vmem:[%s2516_s3] sm:$0xff] (!%p458_p2)  ;;  %v540_v1 = vld [vmem:[%s2516_s3 + $0x8] sm:$0xff] (!%p458_p2)  ;;  %p517_p3 = scmp.lt.s32.totalorder (!%p458_p2), %s1765_s19, 1  ;;  %v2096_v2 = vmov (!%p458_p2), 0.0|0.0   ;;  %vm2097_vm0 = vmmov (!%p458_p2), 0   ;;  %v2098_v4 = vmov (!%p458_p2), 0.0  }
   0x6   : > { %461 = sbr.rel (%p458_p2) target bundleno = 1595 (0x63b), region = 76  ;;  %1967 = vmatprep.subr.bf16.mxu1 (!%p458_p2), %v2096_v2  ;;  %v1968_v3 = vpack.c.bf16 (!%p458_p2), %v540_v1, %v539_v0  ;;  %1912 = vmatprep.mubr.msk.f32.mxu1 (!%p458_p2), %vm2097_vm0, %v2098_v4  ;;  %v542_v5 = vld [vmem:[%s2518_s5] sm:$0xff] (!%p458_p2)  ;;  %v543_v6 = vld [vmem:[%s2518_s5 + $0x8] sm:$0xff] (!%p458_p2)  ;;  %vm611_vm1 = vcmask (!%p458_p2), 130048   ;;  %v551_v15 = vld [vmem:[%s2522_s9 + $0x18] sm:$0xff] (!%p458_p2)  ;;  %vm927_vm2 = vcmask (!%p458_p2), 64512  }
   0x7   : > { %1016 = vmatprep.mubr.f32.mxu0 (!%p458_p2), %v2098_v4  ;;  %v1971_v7 = vpack.c.bf16 (!%p458_p2), %v543_v6, %v542_v5  ;;  %v545_v8 = vld [vmem:[%s2520_s7] sm:$0xff] (!%p458_p2)  ;;  %v546_v9 = vld [vmem:[%s2520_s7 + $0x8] sm:$0xff] (!%p458_p2)  ;;  %v550_v18 = vld [vmem:[%s2522_s9 + $0x10] sm:$0xff] (!%p458_p2)  ;;  %vm1497_vm5 = vcmask (!%p458_p2), 523264  }
   0x8   : > { %1969 = vmatpush3.bf16.msra.mxu1 (!%p458_p2), %v1968_v3  ;;  %v1974_v12 = vpack.c.bf16 (!%p458_p2), %v546_v9, %v545_v8  ;;  %v549_v14 = vld [vmem:[%s2522_s9 + $0x8] sm:$0xff] (!%p458_p2)  ;;  %v548_v17 = vld [vmem:[%s2522_s9] sm:$0xff] (!%p458_p2)  ;;  %v555_v21 = vld [vmem:[%s2523_s10 + $0x18] sm:$0xff] (!%p458_p2) }
   0x9   : > { %1970 = vmatprep.subr.bf16.mxu1 (!%p458_p2), %v2096_v2  ;;  %v1976_v16 = vpack.c.bf16 (!%p458_p2), %v551_v15, %v549_v14  ;;  %v1978_v19 = vpack.c.bf16 (!%p458_p2), %v550_v18, %v548_v17  ;;  %v553_v20 = vld [vmem:[%s2523_s10 + $0x8] sm:$0xff] (!%p458_p2)  ;;  %v1779_v25 = vld [vmem:[%s2519_s6] ss:$0 sm:$0xff] (!%p458_p2)  ;;  %v554_v27 = vld [vmem:[%s2523_s10 + $0x10] sm:$0xff] (!%p458_p2) }
   0xa   : > { %v1980_v22 = vpack.c.bf16 (!%p458_p2), %v555_v21, %v553_v20  ;;  %v552_v26 = vld [vmem:[%s2523_s10] sm:$0xff] (!%p458_p2)  ;;  %v589_v39 = vld [vmem:[%s2526_s13 + $0x88] sm:$0xff] (!%p458_p2)  ;;  %v590_v42 = vld [vmem:[%s2526_s13 + $0x90] sm:$0xff] (!%p458_p2) }
   0xb   : > { %v1781_v31 = vld [vmem:[%s2521_s8] ss:$0 sm:$0xff] (!%p458_p2)  ;;  %v1982_v32 = vpack.c.bf16 (!%p458_p2), %v554_v27, %v552_v26  ;;  %v573_v41 = vld [vmem:[%s2526_s13 + $0x8] sm:$0xff] (!%p458_p2)  ;;  %v591_v43 = vld [vmem:[%s2526_s13 + $0x98] sm:$0xff] (!%p458_p2) }
   0xc   : > { %v588_v38 = vld [vmem:[%s2526_s13 + $0x80] sm:$0xff] (!%p458_p2)  ;;  %v1988_v49 = vpack.c.bf16 (!%p458_p2), %v591_v43, %v590_v42  ;;  %v574_v50 = vld [vmem:[%s2526_s13 + $0x10] sm:$0xff] (!%p458_p2)  ;;  %v575_v51 = vld [vmem:[%s2526_s13 + $0x18] sm:$0xff] (!%p458_p2) }
   0xd   : > { %s2532_s19 = smov (!%p517_p3, %s1765_s19), 1  ;;  %v572_v40 = vld [vmem:[%s2526_s13] sm:$0xff]  ;;  %v1984_v45 = vpack.c.bf16 %v589_v39, %v588_v38  ;;  %v593_v54 = vld [vmem:[%s2526_s13 + $0xa8] sm:$0xff]  ;;  %v1990_v58 = vpack.c.bf16 %v575_v51, %v574_v50  ;;  %v594_v62 = vld [vmem:[%s2526_s13 + $0xb0] sm:$0xff] }
   0xe   : > { %s1770_s28 = sshll.u32 %s2532_s19, 3  ;;  %v556_v47 = vld [vmem:[%s2524_s11] sm:$0xff]  ;;  %v1986_v48 = vpack.c.bf16 %v573_v41, %v572_v40  ;;  %v557_v57 = vld [vmem:[%s2524_s11 + $0x8] sm:$0xff]  ;;  %v595_v63 = vld [vmem:[%s2526_s13 + $0xb8] sm:$0xff]  ;;  %s1823_s17 = sshll.u32 %s2532_s19, 4 }
   0xf   : > { %s520_s16 = scalar_lea.vmem %s2513_s0, %s1770_s28  ;;  %s524_s21 = scalar_lea.vmem %s2514_s1, %s1770_s28  ;;  %v592_v53 = vld [vmem:[%s2526_s13 + $0xa0] sm:$0xff]  ;;  %v577_v61 = vld [vmem:[%s2526_s13 + $0x28] sm:$0xff]  ;;  %v558_v1 = vld [vmem:[%s2524_s11 + $0x10] sm:$0xff]  ;;  %v1996_v5 = vpack.c.bf16 %v595_v63, %v594_v62 }
  0x10   : > { %v2220_v10 = vld [vmem:[%s520_s16] sm:$0xff]  ;;  %s528_s29 = scalar_lea.vmem %s2515_s2, %s1770_s28  ;;  %v1992_v59 = vpack.c.bf16 %v593_v54, %v592_v53  ;;  %v565_v0 = vld [vmem:[%s2525_s12 + $0x8] sm:$0xff]  ;;  %v578_v6 = vld [vmem:[%s2526_s13 + $0x30] sm:$0xff]  ;;  %s533_s24 = scalar_lea.vmem %s2527_s14, %s1823_s17 }
  0x11   : > { %1913 = vmatmul.mubr.msk.f32.vlgmr.msra.gmra.mrb[0].mxu1 %vm611_vm1, %v2220_v10  ;;  %v686_v11 = vld [vmem:[%s524_s21] sm:$0xff]  ;;  %v597_v9 = vld [vmem:[%s2526_s13 + $0xc8] sm:$0xff]  ;;  %v598_v17 = vld [vmem:[%s2526_s13 + $0xd0] sm:$0xff]  ;;  %s538_s21 = scalar_lea.vmem %s2528_s15, %s1823_s17 }
  0x12   : > { %1972 = vmatpush3.bf16.msra.mxu1 %v1971_v7  ;;  %1919 = vmatprep.mubr.msk.f32.mxu1 %vm2097_vm0, %v2098_v4  ;;  %v767_v13 = vld [vmem:[%s528_s29] sm:$0xff]  ;;  %v579_v7 = vld [vmem:[%s2526_s13 + $0x38] sm:$0xff]  ;;  %v601_v27 = vld [vmem:[%s2526_s13 + $0xe8] sm:$0xff]  ;;  %s2099_s29 = smov 112  }
  0x13   : > { %1973 = vmatprep.subr.bf16.mxu1 %v2096_v2  ;;  %v564_v56 = vld [vmem:[%s2525_s12] sm:$0xff]  ;;  %v599_v18 = vld [vmem:[%s2526_s13 + $0xd8] sm:$0xff]  ;;  %v602_v40 = vld [vmem:[%s2526_s13 + $0xf0] sm:$0xff] }
  0x14   : > { %v576_v60 = vld [vmem:[%s2526_s13 + $0x20] sm:$0xff]  ;;  %v563_v38 = vld [vmem:[%s2524_s11 + $0x38] sm:$0xff]  ;;  %v586_v43 = vld [vmem:[%s2526_s13 + $0x70] sm:$0xff] }
  0x15   : > { %1920 = vmatmul.mubr.msk.f32.vlgmr.msra.gmra.mrb[2].mxu1 %vm611_vm1, %v686_v11  ;;  %v1994_v3 = vpack.c.bf16 %v577_v61, %v576_v60  ;;  %v596_v8 = vld [vmem:[%s2526_s13 + $0xc0] sm:$0xff]  ;;  %v566_v11 = vld [vmem:[%s2525_s12 + $0x10] sm:$0xff]  ;;  %v571_v39 = vld [vmem:[%s2525_s12 + $0x38] sm:$0xff] }
  0x16   : > { %1975 = vmatpush3.bf16.msra.mxu1 %v1974_v12  ;;  %1926 = vmatprep.mubr.msk.f32.mxu1 %vm2097_vm0, %v2098_v4  ;;  %v559_v12 = vld [vmem:[%s2524_s11 + $0x18] sm:$0xff]  ;;  %v2000_v14 = vpack.c.bf16 %v597_v9, %v596_v8  ;;  %v580_v15 = vld [vmem:[%s2526_s13 + $0x40] sm:$0xff]  ;;  %vm2453_vm3 = vmpackc.low %vm611_vm1, %vm611_vm1 }
  0x17   : > { %1977 = vmatprep.subr.bf16.mxu1 %v1976_v16  ;;  %v581_v16 = vld [vmem:[%s2526_s13 + $0x48] sm:$0xff]  ;;  %v560_v20 = vld [vmem:[%s2524_s11 + $0x20] sm:$0xff]  ;;  %v603_v41 = vld [vmem:[%s2526_s13 + $0xf8] sm:$0xff] }
  0x18   : > { %v2002_v21 = vpack.c.bf16 %v581_v16, %v580_v15  ;;  %v600_v26 = vld [vmem:[%s2526_s13 + $0xe0] sm:$0xff]  ;;  %v2012_v42 = vpack.c.bf16 %v603_v41, %v602_v40 }
  0x19   : > { %1927 = vmatmul.mubr.msk.f32.vlgmr.msra.gmra.mrb[4].mxu1 %vm611_vm1, %v767_v13  ;;  %v1998_v13 = vpack.c.bf16 %v579_v7, %v578_v6 }
  0x1a   : > { %920 = vmatprep.mubr.f32.mxu1 %v2098_v4  ;;  %1979 = vmatpush1.bf16.msra.mxu1 %v1978_v19  ;;  %v567_v19 = vld [vmem:[%s2525_s12 + $0x18] sm:$0xff] }
  0x1b   : > { %1981 = vmatprep.subr.bf16.mxu1 %v1980_v22  ;;  %v2004_v22 = vpack.c.bf16 %v599_v18, %v598_v17 }
  0xe4   : > { %v2253_v23 = vpop.f32.mrb[0].mxu1 }
  0xe5   : > { %v1914_v24 = vpop.f32.mrb[1].mxu1 }
  0xe6   : > { %v582_v24 = vld [vmem:[%s2526_s13 + $0x50] sm:$0xff] }
  0xe8   : > { %v762_v28 = vpop.f32.mrb[2].mxu1 }
  0xe9   : > { %v763_v29 = vadd.f32 %v1779_v25, %v762_v28  ;;  %v1921_v30 = vpop.f32.mrb[3].mxu1  ;;  %v583_v25 = vld [vmem:[%s2526_s13 + $0x58] sm:$0xff]  ;;  %v568_v28 = vld [vmem:[%s2525_s12 + $0x20] sm:$0xff] }
  0xea   : > { %v2006_v30 = vpack.c.bf16 %v583_v25, %v582_v24 }
  0xeb   : > { %v766_v33 = vmax.f32 %v763_v29, 0.0  ;;  %v561_v29 = vld [vmem:[%s2524_s11 + $0x28] sm:$0xff] }
  0xec   : > { %v843_v34 = vpop.f32.mrb[4].mxu1 }
  0xed   : > { %v844_v35 = vadd.f32 %v1781_v31, %v843_v34  ;;  %v1928_v36 = vpop.f32.mrb[5].mxu1  ;;  %1783 = vmatmul.mubr.msk.f32.vlgmr.msra.gmra.mrb[6].mxu1 %vm611_vm1, %v766_v33  ;;  %v2008_v31 = vpack.c.bf16 %v601_v27, %v600_v26  ;;  %v585_v33 = vld [vmem:[%s2526_s13 + $0x68] sm:$0xff] }
  0xee   : > { %1983 = vmatpush1.bf16.msra.mxu1 %v1982_v32  ;;  %1132 = vmatprep.mubr.f32.mxu1 %v2098_v4  ;;  %v584_v32 = vld [vmem:[%s2526_s13 + $0x60] sm:$0xff]  ;;  %v569_v34 = vld [vmem:[%s2525_s12 + $0x28] sm:$0xff] }
  0xef   : > { %v847_v37 = vmax.f32 %v844_v35, 0.0  ;;  %v562_v35 = vld [vmem:[%s2524_s11 + $0x30] sm:$0xff]  ;;  %v2010_v36 = vpack.c.bf16 %v585_v33, %v584_v32 }
  0xf1   : > { %1792 = vmatmul.mubr.msk.f32.vlgmr.msra.gmra.mrb[8].mxu1 %vm611_vm1, %v847_v37  ;;  %v570_v37 = vld [vmem:[%s2525_s12 + $0x30] sm:$0xff] }
  0xf2   : > { %1227 = vmatprep.mubr.f32.mxu1 %v2098_v4 }
 0x1c0   : > { %v922_v44 = vpop.f32.mrb[6].mxu1 }
 0x1c1   : > { %v924_v46 = vpop.f32.mrb[7].mxu1 }
 0x1c2   : > { %952 = vmatprep.subr.mxu0 %v924_v46 }
 0x1c3   : > { %953 = vmatpush1.msra.mxu0 %v922_v44  ;;  %v587_v44 = vld [vmem:[%s2526_s13 + $0x78] sm:$0xff] }
 0x1c4   : > { %v1134_v52 = vpop.f32.mrb[8].mxu1  ;;  %1784 = vmatmul.mubr.msk.f32.vlgmr.msra.gmra.mrb[0].mxu0 %vm927_vm2, %v556_v47  ;;  %1985 = vmatprep.subr.bf16.mxu0 %v1984_v45  ;;  %v2014_v45 = vpack.c.bf16 %v587_v44, %v586_v43 }
 0x1c5   : > { %v1136_v55 = vpop.f32.mrb[9].mxu1  ;;  %1022 = vmatprep.mubr.f32.mxu0 %v2098_v4  ;;  %1987 = vmatpush3.bf16.msra.mxu0 %v1986_v48 }
 0x1c6   : > { %1163 = vmatprep.subr.mxu1 %v1136_v55  ;;  %1989 = vmatprep.subr.bf16.mxu0 %v1988_v49 }
 0x1c7   : > { %1164 = vmatpush1.msra.mxu1 %v1134_v52 }
 0x1c8   : > { %1793 = vmatmul.mubr.msk.f32.vlgmr.msra.gmra.mrb[10].mxu1 %vm927_vm2, %v564_v56  ;;  %1785 = vmatmul.mubr.msk.f32.gmra.mrb[2].mxu0 %vm927_vm2, %v557_v57 }
 0x1c9   : > { %1233 = vmatprep.mubr.f32.mxu1 %v2098_v4  ;;  %1028 = vmatprep.mubr.f32.mxu0 %v2098_v4 }
 0x1ca   : > { %1991 = vmatpush3.bf16.msra.mxu0 %v1990_v58  ;;  %2016 = vmatprep.subr.bf16.mxu1 %v2096_v2 }
 0x1cb   : > { %1993 = vmatprep.subr.bf16.mxu0 %v1992_v59 }
 0x1cc   : > { %1794 = vmatmul.mubr.msk.f32.gmra.mrb[12].mxu1 %vm927_vm2, %v565_v0  ;;  %1786 = vmatmul.mubr.msk.f32.gmra.mrb[4].mxu0 %vm927_vm2, %v558_v1 }
 0x1cd   : > { %1239 = vmatprep.mubr.f32.mxu1 %v2098_v4  ;;  %1034 = vmatprep.mubr.f32.mxu0 %v2098_v4 }
 0x1ce   : > { %1995 = vmatpush3.bf16.msra.mxu0 %v1994_v3 }
 0x1cf   : > { %1997 = vmatprep.subr.bf16.mxu0 %v1996_v5 }
 0x1d0   : > { %1795 = vmatmul.mubr.msk.f32.gmra.mrb[14].mxu1 %vm927_vm2, %v566_v11  ;;  %1787 = vmatmul.mubr.msk.f32.gmra.mrb[6].mxu0 %vm927_vm2, %v559_v12 }
 0x1d1   : > { %1245 = vmatprep.mubr.f32.mxu1 %v2098_v4  ;;  %1040 = vmatprep.mubr.f32.mxu0 %v2098_v4 }
 0x1d2   : > { %1999 = vmatpush3.bf16.msra.mxu0 %v1998_v13 }
 0x1d3   : > { %2001 = vmatprep.subr.bf16.mxu0 %v2000_v14 }
 0x1d4   : > { %1796 = vmatmul.mubr.msk.f32.gmra.mrb[16].mxu1 %vm927_vm2, %v567_v19  ;;  %1788 = vmatmul.mubr.msk.f32.gmra.mrb[8].mxu0 %vm927_vm2, %v560_v20 }
 0x1d5   : > { %1251 = vmatprep.mubr.f32.mxu1 %v2098_v4  ;;  %1046 = vmatprep.mubr.f32.mxu0 %v2098_v4 }
 0x1d6   : > { %2003 = vmatpush3.bf16.msra.mxu0 %v2002_v21 }
 0x1d7   : > { %2005 = vmatprep.subr.bf16.mxu0 %v2004_v22 }
 0x1d8   : > { %1797 = vmatmul.mubr.msk.f32.gmra.mrb[18].mxu1 %vm927_vm2, %v568_v28  ;;  %1789 = vmatmul.mubr.msk.f32.gmra.mrb[10].mxu0 %vm927_vm2, %v561_v29 }
 0x1d9   : > { %1257 = vmatprep.mubr.f32.mxu1 %v2098_v4  ;;  %1052 = vmatprep.mubr.f32.mxu0 %v2098_v4 }
 0x1da   : > { %2007 = vmatpush3.bf16.msra.mxu0 %v2006_v30 }
 0x1db   : > { %2009 = vmatprep.subr.bf16.mxu0 %v2008_v31 }
 0x1dc   : > { %1798 = vmatmul.mubr.msk.f32.gmra.mrb[20].mxu1 %vm927_vm2, %v569_v34  ;;  %1790 = vmatmul.mubr.msk.f32.gmra.mrb[12].mxu0 %vm927_vm2, %v562_v35 }
 0x1dd   : > { %1263 = vmatprep.mubr.f32.mxu1 %v2098_v4  ;;  %1058 = vmatprep.mubr.f32.mxu0 %v2098_v4 }
 0x1de   : > { %2011 = vmatpush3.bf16.msra.mxu0 %v2010_v36 }
 0x1df   : > { %2013 = vmatprep.subr.bf16.mxu0 %v2012_v42 }
 0x1e0   : > { %1799 = vmatmul.mubr.msk.f32.gmra.mrb[22].mxu1 %vm927_vm2, %v570_v37  ;;  %1791 = vmatmul.mubr.msk.f32.gmra.mrb[14].mxu0 %vm927_vm2, %v563_v38 }
 0x1e1   : > { %1269 = vmatprep.mubr.f32.mxu1 %v2098_v4 }
 0x1e2   : > { %2015 = vmatpush3.bf16.msra.mxu0 %v2014_v45 }
 0x1e3   : > { %2032 = vmatprep.subr.bf16.mxu0 %v2096_v2 }
 0x1e4   : > { %1800 = vmatmul.mubr.msk.f32.gmra.mrb[24].mxu1 %vm927_vm2, %v571_v39 }
 0x1e5   : > { %1945 = vmatprep.mubr.msk.f32.mxu1 %vm2097_vm0, %v2098_v4 }
 0x297   : > { %v1018_v46 = vpop.f32.mrb[0].mxu0 }
 0x298   : > { %v1020_v47 = vpop.f32.mrb[1].mxu0 }
 0x29b   : > { %v1229_v48 = vpop.f32.mrb[10].mxu1  ;;  %v1024_v49 = vpop.f32.mrb[2].mxu0 }
 0x29c   : > { %v1276_v50 = vmul.f32 %v1229_v48, %v1018_v46  ;;  %v1231_v51 = vpop.f32.mrb[11].mxu1  ;;  %v1026_v52 = vpop.f32.mrb[3].mxu0 }
 0x29d   : > { %v1277_v53 = vmul.f32 %v1231_v51, %v1020_v47 }
 0x29f   : > { %v1235_v54 = vpop.f32.mrb[12].mxu1  ;;  %1356 = vmatprep.mubr.f32.mxu0 %v1277_v53  ;;  %v1030_v55 = vpop.f32.mrb[4].mxu0 }
 0x2a0   : > { %v1278_v56 = vmul.f32 %v1235_v54, %v1024_v49  ;;  %v1237_v57 = vpop.f32.mrb[13].mxu1  ;;  %1357 = vmatmul.mubr.f32.vlgmr.msra.gmra.mrb[16].mxu0 %v1276_v50  ;;  %v1032_v58 = vpop.f32.mrb[5].mxu0 }
 0x2a1   : > { %v1279_v59 = vmul.f32 %v1237_v57, %v1026_v52 }
 0x2a3   : > { %v1241_v60 = vpop.f32.mrb[14].mxu1  ;;  %1361 = vmatprep.mubr.f32.mxu0 %v1279_v59  ;;  %v1036_v61 = vpop.f32.mrb[6].mxu0 }
 0x2a4   : > { %v1280_v62 = vmul.f32 %v1241_v60, %v1030_v55  ;;  %v1243_v63 = vpop.f32.mrb[15].mxu1  ;;  %1362 = vmatmul.mubr.f32.gmra.mrb[18].mxu0 %v1278_v56  ;;  %v1038_v0 = vpop.f32.mrb[7].mxu0 }
 0x2a5   : > { %v1281_v1 = vmul.f32 %v1243_v63, %v1032_v58 }
 0x2a7   : > { %v1247_v3 = vpop.f32.mrb[16].mxu1  ;;  %1366 = vmatprep.mubr.f32.mxu0 %v1281_v1  ;;  %v1042_v5 = vpop.f32.mrb[8].mxu0 }
 0x2a8   : > { %v1282_v6 = vmul.f32 %v1247_v3, %v1036_v61  ;;  %v1249_v7 = vpop.f32.mrb[17].mxu1  ;;  %1367 = vmatmul.mubr.f32.gmra.mrb[20].mxu0 %v1280_v62  ;;  %v1044_v8 = vpop.f32.mrb[9].mxu0 }
 0x2a9   : > { %v1283_v9 = vmul.f32 %v1249_v7, %v1038_v0  ;;  %v1777_v0 = vld [vmem:[%s2517_s4] ss:$0 sm:$0xff]  ;;  %v848_v7 = vand.u32 2147483647, %v2220_v10 }
 0x2ab   : > { %v1253_v11 = vpop.f32.mrb[18].mxu1  ;;  %1371 = vmatprep.mubr.f32.mxu0 %v1283_v9  ;;  %v1048_v12 = vpop.f32.mrb[10].mxu0 }
 0x2ac   : > { %v1284_v13 = vmul.f32 %v1253_v11, %v1042_v5  ;;  %v1255_v14 = vpop.f32.mrb[19].mxu1  ;;  %1372 = vmatmul.mubr.f32.gmra.mrb[22].mxu0 %v1282_v6  ;;  %v1050_v15 = vpop.f32.mrb[11].mxu0  ;;  %v682_v5 = vadd.f32 %v1777_v0, %v2253_v23 }
 0x2ad   : > { %v1285_v16 = vmul.f32 %v1255_v14, %v1044_v8  ;;  %v849_v8 = vsel %vm611_vm1, %v848_v7, 0.0 }
 0x2ae   : > { %v685_v6 = vmax.f32 %v682_v5, 0.0 }
 0x2af   : > { %v1259_v17 = vpop.f32.mrb[20].mxu1  ;;  %1376 = vmatprep.mubr.f32.mxu0 %v1285_v16  ;;  %v1054_v18 = vpop.f32.mrb[12].mxu0 }
 0x2b0   : > { %v1286_v19 = vmul.f32 %v1259_v17, %v1048_v12  ;;  %v1261_v20 = vpop.f32.mrb[21].mxu1  ;;  %1377 = vmatmul.mubr.f32.gmra.mrb[24].mxu0 %v1284_v13  ;;  %v1056_v21 = vpop.f32.mrb[13].mxu0 }
 0x2b1   : > { %v1287_v22 = vmul.f32 %v1261_v20, %v1050_v15 }
 0x2b3   : > { %v1265_v24 = vpop.f32.mrb[22].mxu1  ;;  %1381 = vmatprep.mubr.f32.mxu0 %v1287_v22  ;;  %v1060_v25 = vpop.f32.mrb[14].mxu0 }
 0x2b4   : > { %v1288_v26 = vmul.f32 %v1265_v24, %v1054_v18  ;;  %v1267_v27 = vpop.f32.mrb[23].mxu1  ;;  %1382 = vmatmul.mubr.f32.gmra.mrb[26].mxu0 %v1286_v19  ;;  %v1062_v28 = vpop.f32.mrb[15].mxu0 }
 0x2b5   : > { %v1289_v29 = vmul.f32 %v1267_v27, %v1056_v21 }
 0x2b7   : > { %v1271_v30 = vpop.f32.mrb[24].mxu1  ;;  %1386 = vmatprep.mubr.f32.mxu0 %v1289_v29 }
 0x2b8   : > { %v1290_v31 = vmul.f32 %v1271_v30, %v1060_v25  ;;  %v1273_v32 = vpop.f32.mrb[25].mxu1  ;;  %1387 = vmatmul.mubr.f32.gmra.mrb[28].mxu0 %v1288_v26 }
 0x2b9   : > { %v1291_v33 = vmul.f32 %v1273_v32, %v1062_v28 }
 0x2bb   : > { %1391 = vmatprep.mubr.f32.mxu0 %v1291_v33 }
 0x2bc   : > { %1392 = vmatmul.mubr.f32.gmra.mrb[30].mxu0 %v1290_v31 }
 0x2bd   : > { %1964 = vmatprep.mubr.msk.f32.mxu0 %vm2097_vm0, %v2098_v4 }
 0x373   : > { %v1866_v34 = vpop.f32.mrb[16].mxu0 }
 0x374   : > { %v1867_v35 = vpop.f32.mrb[17].mxu0 }
 0x375   : > { %v1868_v36 = vadd.f32 %v1867_v35, %v1866_v34 }
 0x377   : > { %v1869_v37 = vpop.f32.mrb[18].mxu0 }
 0x378   : > { %v1870_v38 = vpop.f32.mrb[19].mxu0 }
 0x379   : > { %v1871_v39 = vadd.f32 %v1870_v38, %v1869_v37 }
 0x37b   : > { %v2017_v41 = vpack.c.bf16 %v1871_v39, %v1868_v36  ;;  %v1872_v42 = vpop.f32.mrb[20].mxu0  ;;  %v2060_v43 = vpack.i.bf16 %v1871_v39, %v1868_v36 }
 0x37c   : > { %v1873_v44 = vpop.f32.mrb[21].mxu0 }
 0x37d   : > { %v1874_v45 = vadd.f32 %v1873_v44, %v1872_v42  ;;  %2061 = vrot.lane.b32.xlu0 %v2060_v43, %s2099_s29  ;;  %2019 = vmatpush3.bf16.xpose.msk.msra.mxu1 %vm2453_vm3, %v2017_v41 }
 0x37e   : > { %2020 = vmatprep.subr.bf16.mxu1 %v2096_v2 }
 0x37f   : > { %v1875_v4 = vpop.f32.mrb[22].mxu0 }
 0x380   : > { %v1876_v46 = vpop.f32.mrb[23].mxu0 }
 0x381   : > { %v1877_v47 = vadd.f32 %v1876_v46, %v1875_v4 }
 0x383   : > { %v2065_v48 = vpack.i.bf16 %v1877_v47, %v1874_v45  ;;  %v2021_v49 = vpack.c.bf16 %v1877_v47, %v1874_v45  ;;  %v1878_v50 = vpop.f32.mrb[24].mxu0 }
 0x384   : > { %v1879_v51 = vpop.f32.mrb[25].mxu0 }
 0x385   : > { %v1880_v52 = vadd.f32 %v1879_v51, %v1878_v50  ;;  %2066 = vrot.lane.b32.xlu0 %v2065_v48, %s2099_s29  ;;  %2023 = vmatpush3.bf16.xpose.msk.msra.mxu1 %vm2453_vm3, %v2021_v49 }
 0x386   : > { %2024 = vmatprep.subr.bf16.mxu1 %v2096_v2 }
 0x387   : > { %v1881_v53 = vpop.f32.mrb[26].mxu0 }
 0x388   : > { %v1882_v54 = vpop.f32.mrb[27].mxu0 }
 0x389   : > { %v1883_v55 = vadd.f32 %v1882_v54, %v1881_v53 }
 0x38b   : > { %v2025_v56 = vpack.c.bf16 %v1883_v55, %v1880_v52  ;;  %v1884_v57 = vpop.f32.mrb[28].mxu0  ;;  %v2070_v58 = vpack.i.bf16 %v1883_v55, %v1880_v52 }
 0x38c   : > { %v1885_v59 = vpop.f32.mrb[29].mxu0 }
 0x38d   : > { %v1886_v60 = vadd.f32 %v1885_v59, %v1884_v57  ;;  %2071 = vrot.lane.b32.xlu1 %v2070_v58, %s2099_s29  ;;  %2027 = vmatpush3.bf16.xpose.msk.msra.mxu1 %vm2453_vm3, %v2025_v56 }
 0x38e   : > { %2028 = vmatprep.subr.bf16.mxu1 %v2096_v2 }
 0x38f   : > { %v1887_v61 = vpop.f32.mrb[30].mxu0 }
 0x390   : > { %v1888_v62 = vpop.f32.mrb[31].mxu0 }
 0x391   : > { %v1889_v63 = vadd.f32 %v1888_v62, %v1887_v61 }
 0x393   : > { %v2075_v1 = vpack.i.bf16 %v1889_v63, %v1886_v60  ;;  %v2029_v3 = vpack.c.bf16 %v1889_v63, %v1886_v60 }
 0x395   : > { %2076 = vrot.lane.b32.xlu1 %v2075_v1, %s2099_s29  ;;  %2031 = vmatpush3.bf16.xpose.msk.msra.mxu1 %vm2453_vm3, %v2029_v3 }
 0x39c   : > { %1946 = vmatmul.mubr.msk.f32.vlgmr.msra.gmra.mrb[26].mxu1 %vm611_vm1, %v685_v6 }
 0x3a4   : > { %850 = vadd.xlane.f32.xlu0 %v849_v8 }
 0x3ef   : > { %v2062_v9 = vpop.permute.xlu0 %2061 }
 0x3f0   : > { %v2064_v11 = vunpack.i.h.bf16 %v2062_v9  ;;  %v2063_v12 = vunpack.i.l.bf16 %v2062_v9 }
 0x3f2   : > { %v2033_v13 = vpack.c.bf16 %v2064_v11, %v2063_v12 }
 0x3f4   : > { %2035 = vmatpush3.bf16.xpose.msk.msra.mxu0 %vm2453_vm3, %v2033_v13 }
 0x3f5   : > { %2036 = vmatprep.subr.bf16.mxu0 %v2096_v2 }
 0x3f7   : > { %v2067_v14 = vpop.permute.xlu0 %2066 }
 0x3f8   : > { %v2069_v15 = vunpack.i.h.bf16 %v2067_v14  ;;  %v2068_v23 = vunpack.i.l.bf16 %v2067_v14 }
 0x3fa   : > { %v2037_v16 = vpack.c.bf16 %v2069_v15, %v2068_v23 }
 0x3fc   : > { %2039 = vmatpush3.bf16.xpose.msk.msra.mxu0 %vm2453_vm3, %v2037_v16 }
 0x3fd   : > { %2040 = vmatprep.subr.bf16.mxu0 %v2096_v2 }
 0x3ff   : > { %v2072_v10 = vpop.permute.xlu1 %2071 }
 0x400   : > { %v2074_v17 = vunpack.i.h.bf16 %v2072_v10  ;;  %v2073_v18 = vunpack.i.l.bf16 %v2072_v10 }
 0x402   : > { %v2041_v19 = vpack.c.bf16 %v2074_v17, %v2073_v18 }
 0x404   : > { %2043 = vmatpush3.bf16.xpose.msk.msra.mxu0 %vm2453_vm3, %v2041_v19 }
 0x405   : > { %2044 = vmatprep.subr.bf16.mxu0 %v2096_v2 }
 0x407   : > { %v2077_v20 = vpop.permute.xlu1 %2076 }
 0x408   : > { %v2079_v21 = vunpack.i.h.bf16 %v2077_v20  ;;  %v2078_v22 = vunpack.i.l.bf16 %v2077_v20 }
 0x40a   : > { %v2045_v24 = vpack.c.bf16 %v2079_v21, %v2078_v22 }
 0x40c   : > { %2047 = vmatpush3.bf16.xpose.msk.msra.mxu0 %vm2453_vm3, %v2045_v24 }
 0x413   : > { %1965 = vmatmul.mubr.msk.f32.vlgmr.msra.gmra.mrb[32].mxu0 %vm611_vm1, %v685_v6 }
 0x431   : > { %v851_v25 = vpop.xlane.xlu0 %850 }
 0x432   : > { %vm852_vm4 = vcmp.eq.f32.partialorder %v851_v25, 0.0 }
 0x46f   : > { %v1490_v26 = vpop.f32.mrb[26].mxu1 }
 0x470   : > { %v1496_v2 = vsel %vm852_vm4, -inf, %v1490_v26  ;;  %v1947_v27 = vpop.f32.mrb[27].mxu1 }
 0x471   : > { %1521 = vst.msk [vmem:[%s538_s21] sm:$0xff] %vm1497_vm5, %v1496_v2  ;;  %v1498_v28 = vsel %vm1497_vm5, %v1496_v2, -inf }
 0x472   : > { %1499 = vmax.xlane.f32.xlu1 %v1498_v28 }
 0x4e6   : > { %v1621_v29 = vpop.f32.mrb[32].mxu0 }
 0x4e7   : > { %v1625_v30 = vsel %vm852_vm4, -inf, %v1621_v29  ;;  %v1966_v31 = vpop.f32.mrb[33].mxu0 }
 0x4e8   : > { %1819 = vst.msk [vmem:[%s538_s21 + $0x8] sm:$0xff] %vm1497_vm5, %v1625_v30  ;;  %v1626_v32 = vsel %vm1497_vm5, %v1625_v30, -inf }
 0x4e9   : > { %1627 = vmax.xlane.f32.xlu0 %v1626_v32 }
 0x4ff   : > { %v1500_v33 = vpop.xlane.xlu1 %1499 }
 0x500   : > { %v1501_v34 = vrot.slane %v1500_v33, 4 }
 0x502   : > { %v1502_v35 = vmax.f32 %v1500_v33, %v1501_v34 }
 0x504   : > { %v1503_v36 = vrot.slane %v1502_v35, 2 }
 0x506   : > { %v1504_v37 = vmax.f32 %v1502_v35, %v1503_v36 }
 0x508   : > { %v1505_v38 = vrot.slane %v1504_v37, 1 }
 0x50a   : > { %v1506_v39 = vmax.f32 %v1504_v37, %v1505_v38 }
 0x50c   : > { %v1507_v40 = vsub.f32 %v1496_v2, %v1506_v39 }
 0x50e   : > { %v1508_v41 = vmul.f32 1.442695, %v1507_v40 }
 0x510   : > { %2080 = vpow2.f32 %v1508_v41 }
 0x51a   : > { %v2081_v42 = vpop.eup %2080 }
 0x51b   : > { %v1510_v43 = vsel %vm1497_vm5, %v2081_v42, 0.0 }
 0x51c   : > { %1511 = vadd.xlane.f32.xlu0 %v1510_v43 }
 0x576   : > { %v1628_v44 = vpop.xlane.xlu0 %1627 }
 0x577   : > { %v1629_v45 = vrot.slane %v1628_v44, 4 }
 0x579   : > { %v1630_v4 = vmax.f32 %v1628_v44, %v1629_v45 }
 0x57b   : > { %v1631_v46 = vrot.slane %v1630_v4, 2 }
 0x57d   : > { %v1632_v47 = vmax.f32 %v1630_v4, %v1631_v46 }
 0x57f   : > { %v1633_v48 = vrot.slane %v1632_v47, 1 }
 0x581   : > { %v1634_v49 = vmax.f32 %v1632_v47, %v1633_v48 }
 0x583   : > { %v1635_v50 = vsub.f32 %v1625_v30, %v1634_v49 }
 0x585   : > { %v1636_v51 = vmul.f32 1.442695, %v1635_v50 }
 0x587   : > { %2082 = vpow2.f32 %v1636_v51 }
 0x591   : > { %v2083_v52 = vpop.eup %2082 }
 0x592   : > { %v1638_v53 = vsel %vm1497_vm5, %v2083_v52, 0.0 }
 0x593   : > { %1639 = vadd.xlane.f32.xlu1 %v1638_v53 }
 0x5a9   : > { %v1512_v54 = vpop.xlane.xlu0 %1511 }
 0x5aa   : > { %v1513_v55 = vrot.slane %v1512_v54, 4 }
 0x5ac   : > { %v1514_v56 = vadd.f32 %v1513_v55, %v1512_v54 }
 0x5ae   : > { %v1515_v57 = vrot.slane %v1514_v56, 2 }
 0x5b0   : > { %v1516_v58 = vadd.f32 %v1515_v57, %v1514_v56 }
 0x5b2   : > { %v1517_v59 = vrot.slane %v1516_v58, 1 }
 0x5b4   : > { %v1518_v60 = vadd.f32 %v1517_v59, %v1516_v58 }
 0x5b6   : > { %2084 = vrcp.f32 %v1518_v60 }
 0x5c0   : > { %v2085_v61 = vpop.eup %2084 }
 0x5c1   : > { %v1520_v62 = vmul.f32 %v2085_v61, %v2081_v42 }
 0x5c3   : > { %1522 = vst.msk [vmem:[%s533_s24] sm:$0xff] %vm1497_vm5, %v1520_v62 }
 0x620   : > { %v1640_v63 = vpop.xlane.xlu1 %1639 }
 0x621   : > { %v1641_v0 = vrot.slane %v1640_v63, 4 }
 0x623   : > { %v1642_v1 = vadd.f32 %v1641_v0, %v1640_v63 }
 0x625   : > { %v1643_v3 = vrot.slane %v1642_v1, 2 }
 0x627   : > { %v1644_v5 = vadd.f32 %v1643_v3, %v1642_v1 }
 0x629   : > { %v1645_v6 = vrot.slane %v1644_v5, 1 }
 0x62b   : > { %v1646_v7 = vadd.f32 %v1645_v6, %v1644_v5 }
 0x62d   : > { %2086 = vrcp.f32 %v1646_v7 }
 0x637   : > { %v2087_v8 = vpop.eup %2086 }
 0x638   : > { %v1648_v9 = vmul.f32 %v2087_v8, %v2083_v52 }
 0x63a   : > { %1820 = vst.msk [vmem:[%s533_s24 + $0x8] sm:$0xff] %vm1497_vm5, %v1648_v9 }
 0x63b PF: > { %s26_s18 = sadd.s32 1, %s2094_s18  }
 0x63c   : > { %p23_p4 = scmp.ge.s32.totalorder %s26_s18, 4  }
 0x63e   :  { %25 = sbr.rel (!%p23_p4) target bundleno = 1 (0x1), region = 126 }

</bundles_post_ra>
